<compile_context>
chip_gen: v5e
topology: v5e:2x2
jax: 0.10.0
libtpu: 0.0.40
codegen_flags: <defaults>
</compile_context>

<pallas_src>
import functools

import jax
import jax.numpy as jnp
from jax import lax
from jax.experimental import pallas as pl
from jax.experimental.pallas import tpu as pltpu

EPS = 1e-5


def _round_up(x, m):
    return (x + m - 1) // m * m


# ------------------------------ Pallas kernel ------------------------------ #

def _conv3x3_bn_kernel(*refs, tap_offsets, images_per_block, add_residual,
                       apply_relu):
    """Dense 3x3 conv (stride 1, pad 1) + BN-shift [+ residual] [+ ReLU].

    Per-grid-step ref shapes:
      w_ref:     (9, Cout, Cin_pad)      bf16  (BN scale folded in; resident)
      shift_ref: (Cout, 1)               f32   (resident)
      x_ref:     (ipb, Cin_pad, L_pad)   bf16  (streamed flat padded input)
      res_ref:   (ipb, Cout, M_pad)      bf16  (streamed, optional)
      o_ref:     (ipb, Cout, M_pad)            (lane-dense output block)

    Output column m = ho * Wp + wo' equals the conv output at (ho, wo') for
    wo' < W; columns wo' in {W, W+1} (and m >= H*Wp) are garbage and cropped
    by the caller.
    """
    if add_residual:
        w_ref, shift_ref, x_ref, res_ref, o_ref = refs
    else:
        w_ref, shift_ref, x_ref, o_ref = refs
        res_ref = None

    m = o_ref.shape[-1]                       # M_pad (multiple of 128)
    shift = shift_ref[...]                    # (Cout, 1) f32

    for i in range(images_per_block):
        x_img = x_ref[i]                      # (Cin_pad, L_pad) bf16
        acc = None
        for t, off in enumerate(tap_offsets):
            part = jnp.dot(w_ref[t], x_img[:, off:off + m],
                           preferred_element_type=jnp.float32)
            acc = part if acc is None else acc + part
        y = acc + shift                       # BN shift (scale already in weights)
        if add_residual:
            y = y + res_ref[i].astype(jnp.float32)
        if apply_relu:
            y = jnp.maximum(y, 0.0)
        o_ref[i] = y.astype(o_ref.dtype)


# -------------------------------- glue (JAX) -------------------------------- #

def _conv3x3_bn_act(x_nchw, w_oihw, bn, *, stride=1, residual=None, relu=True,
                    out_dtype=jnp.float32):
    """Fused conv3x3(pad=1) + BN [+ residual] [+ ReLU] with in-kernel taps.

    `residual` (only allowed for stride=1) must have the conv's output shape
    (N, Cout, H, W); it is streamed in bf16 and added before the ReLU.
    """
    assert residual is None or stride == 1
    N, Cin, H, W = x_nchw.shape
    Cout = w_oihw.shape[0]
    Hp, Wp = H + 2, W + 2
    L_in = Hp * Wp
    M_out = H * Wp                              # dense (stride-1) flat output len
    M_pad = _round_up(M_out, 128)               # lane-dense output columns
    L_pad = _round_up(M_pad + 2 * Wp + 2, 128)  # taps of length M_pad stay in bounds
    Cin_pad = _round_up(Cin, 8)

    # bf16-first padded + flattened input (single cheap pass; no 9x im2col).
    xp = jnp.pad(x_nchw.astype(jnp.bfloat16), ((0, 0), (0, 0), (1, 1), (1, 1)))
    xf = xp.reshape(N, Cin, L_in)
    xf = jnp.pad(xf, ((0, 0), (0, Cin_pad - Cin), (0, L_pad - L_in)))

    # Per-tap weights (9, Cout, Cin_pad) with BN scale folded per output channel.
    inv_std = 1.0 / jnp.sqrt(bn["var"] + EPS)
    scale = bn["gamma"] * inv_std                                  # (Cout,)
    shift = (bn["beta"] - bn["mean"] * scale).reshape(Cout, 1).astype(jnp.float32)
    w_taps = jnp.transpose(w_oihw, (2, 3, 0, 1)).reshape(9, Cout, Cin)
    w_taps = w_taps * scale[None, :, None]
    w_taps = jnp.pad(w_taps, ((0, 0), (0, 0), (0, Cin_pad - Cin)))
    w_taps = w_taps.astype(jnp.bfloat16)

    # Images per grid step: amortize per-step overhead, but keep >= 2 programs
    # so v7x can shard the grid over both TensorCores.
    ipb = 1
    for cand in (8, 4, 2):
        if N % cand == 0 and N // cand >= 2:
            ipb = cand
            break
    grid = (N // ipb,)

    tap_offsets = tuple(dy * Wp + dx for dy in range(3) for dx in range(3))

    add_residual = residual is not None
    args = [w_taps, shift, xf]
    in_specs = [
        pl.BlockSpec((9, Cout, Cin_pad), lambda b: (0, 0, 0)),      # resident
        pl.BlockSpec((Cout, 1), lambda b: (0, 0)),                  # resident
        pl.BlockSpec((ipb, Cin_pad, L_pad), lambda b: (b, 0, 0)),   # streamed
    ]
    if add_residual:
        res = jnp.pad(residual.astype(jnp.bfloat16),
                      ((0, 0), (0, 0), (0, 0), (0, 2)))             # width -> Wp
        res = res.reshape(N, Cout, M_out)
        res = jnp.pad(res, ((0, 0), (0, 0), (0, M_pad - M_out)))
        args.append(res)
        in_specs.append(pl.BlockSpec((ipb, Cout, M_pad), lambda b: (b, 0, 0)))

    out_itemsize = jnp.dtype(out_dtype).itemsize
    bytes_accessed = sum(int(a.size) * a.dtype.itemsize for a in args)
    bytes_accessed += N * Cout * M_pad * out_itemsize
    flops = 2 * N * M_out * Cin_pad * Cout * 9

    kernel = functools.partial(_conv3x3_bn_kernel, tap_offsets=tap_offsets,
                               images_per_block=ipb, add_residual=add_residual,
                               apply_relu=relu)
    out_flat = pl.pallas_call(
        kernel,
        out_shape=jax.ShapeDtypeStruct((N, Cout, M_pad), out_dtype),
        grid=grid,
        in_specs=in_specs,
        out_specs=pl.BlockSpec((ipb, Cout, M_pad), lambda b: (b, 0, 0)),
        compiler_params=pltpu.CompilerParams(
            dimension_semantics=("parallel",),
            vmem_limit_bytes=32 * 1024 * 1024),
        cost_estimate=pl.CostEstimate(flops=flops, transcendentals=0,
                                      bytes_accessed=bytes_accessed),
    )(*args)

    # Crop garbage columns / padding and apply the stride by subsampling the
    # dense output (stride != 1 only occurs on the small downsampling conv1).
    out = out_flat[:, :, :M_out].reshape(N, Cout, H, Wp)
    return out[:, :, ::stride, 0:W:stride]


def basic_block_forward(x_nchw, params, stride):
    """BasicBlock.forward, NCHW in / NCHW out (matching the PyTorch module)."""
    in_planes = x_nchw.shape[1]
    planes = params["w1"].shape[0]

    # conv1 -> bn1 -> relu (fused).  Intermediate kept in bf16 (it is the bf16
    # GEMM operand of conv2 anyway) to halve its HBM traffic.
    out = _conv3x3_bn_act(x_nchw, params["w1"], params["bn1"], stride=stride,
                          residual=None, relu=True, out_dtype=jnp.bfloat16)

    # Shortcut (LambdaLayer "option A" when downsampling / channel change).
    if stride != 1 or in_planes != planes:
        sc = x_nchw[:, :, ::2, ::2]
        pad = planes // 4
        sc = jnp.pad(sc, ((0, 0), (pad, pad), (0, 0), (0, 0)))
    else:
        sc = x_nchw

    # conv2 -> bn2 -> (+shortcut) -> relu (fused).
    out = _conv3x3_bn_act(out, params["w2"], params["bn2"], stride=1,
                          residual=sc, relu=True, out_dtype=jnp.float32)
    return out


# ---------------------------- params / reference ---------------------------- #

def init_basic_block_params(key, in_planes, planes):
    ks = jax.random.split(key, 4)

    def bn_params(k):
        kg, kb, km, kv = jax.random.split(k, 4)
        return dict(
            gamma=jax.random.normal(kg, (planes,), jnp.float32) * 0.1 + 1.0,
            beta=jax.random.normal(kb, (planes,), jnp.float32) * 0.1,
            mean=jax.random.normal(km, (planes,), jnp.float32) * 0.1,
            var=jnp.abs(jax.random.normal(kv, (planes,), jnp.float32)) * 0.1 + 0.5,
        )

    return dict(
        w1=jax.random.normal(ks[0], (planes, in_planes, 3, 3), jnp.float32) * 0.1,
        w2=jax.random.normal(ks[1], (planes, planes, 3, 3), jnp.float32) * 0.1,
        bn1=bn_params(ks[2]),
        bn2=bn_params(ks[3]),
    )


def reference_forward(x_nchw, params, stride):
    """Pure-JAX (XLA, f32) reference of the same forward, for correctness."""
    def conv(x, w, s):
        return lax.conv_general_dilated(
            x, w, (s, s), ((1, 1), (1, 1)),
            dimension_numbers=("NCHW", "OIHW", "NCHW"))

    def bn(x, p):
        scale = p["gamma"] / jnp.sqrt(p["var"] + EPS)
        shift = p["beta"] - p["mean"] * scale
        return x * scale[None, :, None, None] + shift[None, :, None, None]

    in_planes = x_nchw.shape[1]
    planes = params["w1"].shape[0]
    out = jax.nn.relu(bn(conv(x_nchw, params["w1"], stride), params["bn1"]))
    out = bn(conv(out, params["w2"], 1), params["bn2"])
    if stride != 1 or in_planes != planes:
        sc = x_nchw[:, :, ::2, ::2]
        pad = planes // 4
        sc = jnp.pad(sc, ((0, 0), (pad, pad), (0, 0), (0, 0)))
    else:
        sc = x_nchw
    return jax.nn.relu(out + sc)


# ----------------------------------- main ----------------------------------- #

if __name__ == "__main__":
    key = jax.random.PRNGKey(0)
    k1, k2, k3, k4 = jax.random.split(key, 4)

    # Tolerances loosened vs the f32 reference: GEMM operands, the conv1
    # intermediate, the streamed residual and the scale-folded weights are bf16
    # (f32 accumulation in the MXU).
    ATOL = RTOL = 5e-2

    # Case 1: identity shortcut (stride=1, in_planes == planes)
    x1 = jax.random.normal(k1, (2, 8, 16, 16), jnp.float32)
    p1 = init_basic_block_params(k2, in_planes=8, planes=8)
    fwd1 = jax.jit(functools.partial(basic_block_forward, stride=1))
    y1 = jax.block_until_ready(fwd1(x1, p1))
    r1 = reference_forward(x1, p1, stride=1)
    assert y1.shape == (2, 8, 16, 16)
    assert jnp.allclose(y1, r1, atol=ATOL, rtol=RTOL)

    # Case 2: LambdaLayer shortcut (stride=2, in_planes=4 -> planes=8)
    x2 = jax.random.normal(k3, (2, 4, 16, 16), jnp.float32)
    p2 = init_basic_block_params(k4, in_planes=4, planes=8)
    fwd2 = jax.jit(functools.partial(basic_block_forward, stride=2))
    y2 = jax.block_until_ready(fwd2(x2, p2))
    r2 = reference_forward(x2, p2, stride=2)
    assert y2.shape == (2, 8, 8, 8)
    assert jnp.allclose(y2, r2, atol=ATOL, rtol=RTOL)

    print("KERNEL_OK")
</pallas_src>

<mosaic_0001>
module attributes {stable_mosaic.version = 11 : i64} {
  func.func @_conv3x3_bn_kernel(%arg0: i32, %arg1: memref<9x8x8xbf16, #tpu.memory_space<vmem>>, %arg2: memref<8x1xf32, #tpu.memory_space<vmem>>, %arg3: memref<1x8x512xbf16, #tpu.memory_space<vmem>>, %arg4: memref<1x8x384xbf16, #tpu.memory_space<vmem>>) attributes {dimension_semantics = [#tpu.dimension_semantics<parallel>], iteration_bounds = array<i64: 2>, scalar_prefetch = 0 : i64, scratch_operands = 0 : i64, tpu.core_type = #tpu.core_type<tc>, window_params = [{pipeline_mode = #tpu.pipeline_mode<synchronous>, transform_indices = @transform_0, window_bounds = array<i64: 9, 8, 8>}, {pipeline_mode = #tpu.pipeline_mode<synchronous>, transform_indices = @transform_1, window_bounds = array<i64: 8, 1>}, {transform_indices = @transform_2, window_bounds = array<i64: 1, 8, 512>}, {transform_indices = @transform_3, window_bounds = array<i64: 1, 8, 384>}]} {
    %c0 = arith.constant 0 : index
    %c0_0 = arith.constant 0 : index
    %0 = vector.load %arg2[%c0, %c0_0] : memref<8x1xf32, #tpu.memory_space<vmem>>, vector<8x1xf32>
    %c0_1 = arith.constant 0 : index
    %c0_2 = arith.constant 0 : index
    %c0_3 = arith.constant 0 : index
    %1 = vector.load %arg3[%c0_1, %c0_2, %c0_3] : memref<1x8x512xbf16, #tpu.memory_space<vmem>>, vector<1x8x512xbf16>
    %2 = vector.shape_cast %1 : vector<1x8x512xbf16> to vector<8x512xbf16>
    %c0_4 = arith.constant 0 : index
    %c0_5 = arith.constant 0 : index
    %c0_6 = arith.constant 0 : index
    %3 = vector.load %arg1[%c0_4, %c0_5, %c0_6] : memref<9x8x8xbf16, #tpu.memory_space<vmem>>, vector<1x8x8xbf16>
    %4 = vector.shape_cast %3 : vector<1x8x8xbf16> to vector<8x8xbf16>
    %5 = vector.extract_strided_slice %2 {offsets = [0, 0], sizes = [8, 384], strides = [1, 1]} : vector<8x512xbf16> to vector<8x384xbf16>
    %cst = arith.constant dense<0.000000e+00> : vector<8x384xf32>
    %6 = tpu.matmul %4, %5, %cst {dimension_numbers = #tpu.dot_dimension_numbers<[1], [0], [0], [1], [0, 0, 1, 1], [], []>} : vector<8x8xbf16>, vector<8x384xbf16>, vector<8x384xf32> -> vector<8x384xf32>
    %c1 = arith.constant 1 : index
    %c0_7 = arith.constant 0 : index
    %c0_8 = arith.constant 0 : index
    %7 = vector.load %arg1[%c1, %c0_7, %c0_8] : memref<9x8x8xbf16, #tpu.memory_space<vmem>>, vector<1x8x8xbf16>
    %8 = vector.shape_cast %7 : vector<1x8x8xbf16> to vector<8x8xbf16>
    %9 = vector.extract_strided_slice %2 {offsets = [0, 1], sizes = [8, 384], strides = [1, 1]} : vector<8x512xbf16> to vector<8x384xbf16>
    %cst_9 = arith.constant dense<0.000000e+00> : vector<8x384xf32>
    %10 = tpu.matmul %8, %9, %cst_9 {dimension_numbers = #tpu.dot_dimension_numbers<[1], [0], [0], [1], [0, 0, 1, 1], [], []>} : vector<8x8xbf16>, vector<8x384xbf16>, vector<8x384xf32> -> vector<8x384xf32>
    %11 = arith.addf %6, %10 : vector<8x384xf32>
    %c2 = arith.constant 2 : index
    %c0_10 = arith.constant 0 : index
    %c0_11 = arith.constant 0 : index
    %12 = vector.load %arg1[%c2, %c0_10, %c0_11] : memref<9x8x8xbf16, #tpu.memory_space<vmem>>, vector<1x8x8xbf16>
    %13 = vector.shape_cast %12 : vector<1x8x8xbf16> to vector<8x8xbf16>
    %14 = vector.extract_strided_slice %2 {offsets = [0, 2], sizes = [8, 384], strides = [1, 1]} : vector<8x512xbf16> to vector<8x384xbf16>
    %cst_12 = arith.constant dense<0.000000e+00> : vector<8x384xf32>
    %15 = tpu.matmul %13, %14, %cst_12 {dimension_numbers = #tpu.dot_dimension_numbers<[1], [0], [0], [1], [0, 0, 1, 1], [], []>} : vector<8x8xbf16>, vector<8x384xbf16>, vector<8x384xf32> -> vector<8x384xf32>
    %16 = arith.addf %11, %15 : vector<8x384xf32>
    %c3 = arith.constant 3 : index
    %c0_13 = arith.constant 0 : index
    %c0_14 = arith.constant 0 : index
    %17 = vector.load %arg1[%c3, %c0_13, %c0_14] : memref<9x8x8xbf16, #tpu.memory_space<vmem>>, vector<1x8x8xbf16>
    %18 = vector.shape_cast %17 : vector<1x8x8xbf16> to vector<8x8xbf16>
    %19 = vector.extract_strided_slice %2 {offsets = [0, 18], sizes = [8, 384], strides = [1, 1]} : vector<8x512xbf16> to vector<8x384xbf16>
    %cst_15 = arith.constant dense<0.000000e+00> : vector<8x384xf32>
    %20 = tpu.matmul %18, %19, %cst_15 {dimension_numbers = #tpu.dot_dimension_numbers<[1], [0], [0], [1], [0, 0, 1, 1], [], []>} : vector<8x8xbf16>, vector<8x384xbf16>, vector<8x384xf32> -> vector<8x384xf32>
    %21 = arith.addf %16, %20 : vector<8x384xf32>
    %c4 = arith.constant 4 : index
    %c0_16 = arith.constant 0 : index
    %c0_17 = arith.constant 0 : index
    %22 = vector.load %arg1[%c4, %c0_16, %c0_17] : memref<9x8x8xbf16, #tpu.memory_space<vmem>>, vector<1x8x8xbf16>
    %23 = vector.shape_cast %22 : vector<1x8x8xbf16> to vector<8x8xbf16>
    %24 = vector.extract_strided_slice %2 {offsets = [0, 19], sizes = [8, 384], strides = [1, 1]} : vector<8x512xbf16> to vector<8x384xbf16>
    %cst_18 = arith.constant dense<0.000000e+00> : vector<8x384xf32>
    %25 = tpu.matmul %23, %24, %cst_18 {dimension_numbers = #tpu.dot_dimension_numbers<[1], [0], [0], [1], [0, 0, 1, 1], [], []>} : vector<8x8xbf16>, vector<8x384xbf16>, vector<8x384xf32> -> vector<8x384xf32>
    %26 = arith.addf %21, %25 : vector<8x384xf32>
    %c5 = arith.constant 5 : index
    %c0_19 = arith.constant 0 : index
    %c0_20 = arith.constant 0 : index
    %27 = vector.load %arg1[%c5, %c0_19, %c0_20] : memref<9x8x8xbf16, #tpu.memory_space<vmem>>, vector<1x8x8xbf16>
    %28 = vector.shape_cast %27 : vector<1x8x8xbf16> to vector<8x8xbf16>
    %29 = vector.extract_strided_slice %2 {offsets = [0, 20], sizes = [8, 384], strides = [1, 1]} : vector<8x512xbf16> to vector<8x384xbf16>
    %cst_21 = arith.constant dense<0.000000e+00> : vector<8x384xf32>
    %30 = tpu.matmul %28, %29, %cst_21 {dimension_numbers = #tpu.dot_dimension_numbers<[1], [0], [0], [1], [0, 0, 1, 1], [], []>} : vector<8x8xbf16>, vector<8x384xbf16>, vector<8x384xf32> -> vector<8x384xf32>
    %31 = arith.addf %26, %30 : vector<8x384xf32>
    %c6 = arith.constant 6 : index
    %c0_22 = arith.constant 0 : index
    %c0_23 = arith.constant 0 : index
    %32 = vector.load %arg1[%c6, %c0_22, %c0_23] : memref<9x8x8xbf16, #tpu.memory_space<vmem>>, vector<1x8x8xbf16>
    %33 = vector.shape_cast %32 : vector<1x8x8xbf16> to vector<8x8xbf16>
    %34 = vector.extract_strided_slice %2 {offsets = [0, 36], sizes = [8, 384], strides = [1, 1]} : vector<8x512xbf16> to vector<8x384xbf16>
    %cst_24 = arith.constant dense<0.000000e+00> : vector<8x384xf32>
    %35 = tpu.matmul %33, %34, %cst_24 {dimension_numbers = #tpu.dot_dimension_numbers<[1], [0], [0], [1], [0, 0, 1, 1], [], []>} : vector<8x8xbf16>, vector<8x384xbf16>, vector<8x384xf32> -> vector<8x384xf32>
    %36 = arith.addf %31, %35 : vector<8x384xf32>
    %c7 = arith.constant 7 : index
    %c0_25 = arith.constant 0 : index
    %c0_26 = arith.constant 0 : index
    %37 = vector.load %arg1[%c7, %c0_25, %c0_26] : memref<9x8x8xbf16, #tpu.memory_space<vmem>>, vector<1x8x8xbf16>
    %38 = vector.shape_cast %37 : vector<1x8x8xbf16> to vector<8x8xbf16>
    %39 = vector.extract_strided_slice %2 {offsets = [0, 37], sizes = [8, 384], strides = [1, 1]} : vector<8x512xbf16> to vector<8x384xbf16>
    %cst_27 = arith.constant dense<0.000000e+00> : vector<8x384xf32>
    %40 = tpu.matmul %38, %39, %cst_27 {dimension_numbers = #tpu.dot_dimension_numbers<[1], [0], [0], [1], [0, 0, 1, 1], [], []>} : vector<8x8xbf16>, vector<8x384xbf16>, vector<8x384xf32> -> vector<8x384xf32>
    %41 = arith.addf %36, %40 : vector<8x384xf32>
    %c8 = arith.constant 8 : index
    %c0_28 = arith.constant 0 : index
    %c0_29 = arith.constant 0 : index
    %42 = vector.load %arg1[%c8, %c0_28, %c0_29] : memref<9x8x8xbf16, #tpu.memory_space<vmem>>, vector<1x8x8xbf16>
    %43 = vector.shape_cast %42 : vector<1x8x8xbf16> to vector<8x8xbf16>
    %44 = vector.extract_strided_slice %2 {offsets = [0, 38], sizes = [8, 384], strides = [1, 1]} : vector<8x512xbf16> to vector<8x384xbf16>
    %cst_30 = arith.constant dense<0.000000e+00> : vector<8x384xf32>
    %45 = tpu.matmul %43, %44, %cst_30 {dimension_numbers = #tpu.dot_dimension_numbers<[1], [0], [0], [1], [0, 0, 1, 1], [], []>} : vector<8x8xbf16>, vector<8x384xbf16>, vector<8x384xf32> -> vector<8x384xf32>
    %46 = arith.addf %41, %45 : vector<8x384xf32>
    %47 = vector.broadcast %0 : vector<8x1xf32> to vector<8x384xf32>
    %48 = arith.addf %46, %47 : vector<8x384xf32>
    %cst_31 = arith.constant 0.000000e+00 : f32
    %49 = vector.broadcast %cst_31 : f32 to vector<8x384xf32>
    %50 = arith.maximumf %48, %49 : vector<8x384xf32>
    %51 = arith.truncf %50 : vector<8x384xf32> to vector<8x384xbf16>
    %c0_32 = arith.constant 0 : index
    %c0_33 = arith.constant 0 : index
    %c0_34 = arith.constant 0 : index
    %52 = vector.load %arg4[%c0_32, %c0_33, %c0_34] : memref<1x8x384xbf16, #tpu.memory_space<vmem>>, vector<1x8x384xbf16>
    %53 = vector.shape_cast %52 : vector<1x8x384xbf16> to vector<8x384xbf16>
    %54 = vector.shape_cast %51 : vector<8x384xbf16> to vector<1x8x384xbf16>
    tpu.vector_store %arg4[%c0_32, %c0_33, %c0_34], %54 {strides = array<i32>} : memref<1x8x384xbf16, #tpu.memory_space<vmem>>, vector<1x8x384xbf16>,
    return
  }
  func.func @transform_0(%arg0: i32) -> (i32, i32, i32) {
    %c0_i32 = arith.constant 0 : i32
    %c0_i32_0 = arith.constant 0 : i32
    %c0_i32_1 = arith.constant 0 : i32
    %c0_i32_2 = arith.constant 0 : i32
    return %c0_i32, %c0_i32_0, %c0_i32_1 : i32, i32, i32
  }
  func.func @transform_1(%arg0: i32) -> (i32, i32) {
    %c0_i32 = arith.constant 0 : i32
    %c0_i32_0 = arith.constant 0 : i32
    %c0_i32_1 = arith.constant 0 : i32
    return %c0_i32, %c0_i32_0 : i32, i32
  }
  func.func @transform_2(%arg0: i32) -> (i32, i32, i32) {
    %c0_i32 = arith.constant 0 : i32
    %c0_i32_0 = arith.constant 0 : i32
    %c0_i32_1 = arith.constant 0 : i32
    return %arg0, %c0_i32, %c0_i32_0 : i32, i32, i32
  }
  func.func @transform_3(%arg0: i32) -> (i32, i32, i32) {
    %c0_i32 = arith.constant 0 : i32
    %c0_i32_0 = arith.constant 0 : i32
    %c0_i32_1 = arith.constant 0 : i32
    return %arg0, %c0_i32, %c0_i32_0 : i32, i32, i32
  }
}

module attributes {stable_mosaic.version = 11 : i64} {
  func.func @_conv3x3_bn_kernel(%arg0: i32, %arg1: memref<9x8x8xbf16, #tpu.memory_space<vmem>>, %arg2: memref<8x1xf32, #tpu.memory_space<vmem>>, %arg3: memref<1x8x512xbf16, #tpu.memory_space<vmem>>, %arg4: memref<1x8x384xbf16, #tpu.memory_space<vmem>>, %arg5: memref<1x8x384xf32, #tpu.memory_space<vmem>>) attributes {dimension_semantics = [#tpu.dimension_semantics<parallel>], iteration_bounds = array<i64: 2>, scalar_prefetch = 0 : i64, scratch_operands = 0 : i64, tpu.core_type = #tpu.core_type<tc>, window_params = [{pipeline_mode = #tpu.pipeline_mode<synchronous>, transform_indices = @transform_0, window_bounds = array<i64: 9, 8, 8>}, {pipeline_mode = #tpu.pipeline_mode<synchronous>, transform_indices = @transform_1, window_bounds = array<i64: 8, 1>}, {transform_indices = @transform_2, window_bounds = array<i64: 1, 8, 512>}, {transform_indices = @transform_3, window_bounds = array<i64: 1, 8, 384>}, {transform_indices = @transform_4, window_bounds = array<i64: 1, 8, 384>}]} {
    %c0 = arith.constant 0 : index
    %c0_0 = arith.constant 0 : index
    %0 = vector.load %arg2[%c0, %c0_0] : memref<8x1xf32, #tpu.memory_space<vmem>>, vector<8x1xf32>
    %c0_1 = arith.constant 0 : index
    %c0_2 = arith.constant 0 : index
    %c0_3 = arith.constant 0 : index
    %1 = vector.load %arg3[%c0_1, %c0_2, %c0_3] : memref<1x8x512xbf16, #tpu.memory_space<vmem>>, vector<1x8x512xbf16>
    %2 = vector.shape_cast %1 : vector<1x8x512xbf16> to vector<8x512xbf16>
    %c0_4 = arith.constant 0 : index
    %c0_5 = arith.constant 0 : index
    %c0_6 = arith.constant 0 : index
    %3 = vector.load %arg1[%c0_4, %c0_5, %c0_6] : memref<9x8x8xbf16, #tpu.memory_space<vmem>>, vector<1x8x8xbf16>
    %4 = vector.shape_cast %3 : vector<1x8x8xbf16> to vector<8x8xbf16>
    %5 = vector.extract_strided_slice %2 {offsets = [0, 0], sizes = [8, 384], strides = [1, 1]} : vector<8x512xbf16> to vector<8x384xbf16>
    %cst = arith.constant dense<0.000000e+00> : vector<8x384xf32>
    %6 = tpu.matmul %4, %5, %cst {dimension_numbers = #tpu.dot_dimension_numbers<[1], [0], [0], [1], [0, 0, 1, 1], [], []>} : vector<8x8xbf16>, vector<8x384xbf16>, vector<8x384xf32> -> vector<8x384xf32>
    %c1 = arith.constant 1 : index
    %c0_7 = arith.constant 0 : index
    %c0_8 = arith.constant 0 : index
    %7 = vector.load %arg1[%c1, %c0_7, %c0_8] : memref<9x8x8xbf16, #tpu.memory_space<vmem>>, vector<1x8x8xbf16>
    %8 = vector.shape_cast %7 : vector<1x8x8xbf16> to vector<8x8xbf16>
    %9 = vector.extract_strided_slice %2 {offsets = [0, 1], sizes = [8, 384], strides = [1, 1]} : vector<8x512xbf16> to vector<8x384xbf16>
    %cst_9 = arith.constant dense<0.000000e+00> : vector<8x384xf32>
    %10 = tpu.matmul %8, %9, %cst_9 {dimension_numbers = #tpu.dot_dimension_numbers<[1], [0], [0], [1], [0, 0, 1, 1], [], []>} : vector<8x8xbf16>, vector<8x384xbf16>, vector<8x384xf32> -> vector<8x384xf32>
    %11 = arith.addf %6, %10 : vector<8x384xf32>
    %c2 = arith.constant 2 : index
    %c0_10 = arith.constant 0 : index
    %c0_11 = arith.constant 0 : index
    %12 = vector.load %arg1[%c2, %c0_10, %c0_11] : memref<9x8x8xbf16, #tpu.memory_space<vmem>>, vector<1x8x8xbf16>
    %13 = vector.shape_cast %12 : vector<1x8x8xbf16> to vector<8x8xbf16>
    %14 = vector.extract_strided_slice %2 {offsets = [0, 2], sizes = [8, 384], strides = [1, 1]} : vector<8x512xbf16> to vector<8x384xbf16>
    %cst_12 = arith.constant dense<0.000000e+00> : vector<8x384xf32>
    %15 = tpu.matmul %13, %14, %cst_12 {dimension_numbers = #tpu.dot_dimension_numbers<[1], [0], [0], [1], [0, 0, 1, 1], [], []>} : vector<8x8xbf16>, vector<8x384xbf16>, vector<8x384xf32> -> vector<8x384xf32>
    %16 = arith.addf %11, %15 : vector<8x384xf32>
    %c3 = arith.constant 3 : index
    %c0_13 = arith.constant 0 : index
    %c0_14 = arith.constant 0 : index
    %17 = vector.load %arg1[%c3, %c0_13, %c0_14] : memref<9x8x8xbf16, #tpu.memory_space<vmem>>, vector<1x8x8xbf16>
    %18 = vector.shape_cast %17 : vector<1x8x8xbf16> to vector<8x8xbf16>
    %19 = vector.extract_strided_slice %2 {offsets = [0, 18], sizes = [8, 384], strides = [1, 1]} : vector<8x512xbf16> to vector<8x384xbf16>
    %cst_15 = arith.constant dense<0.000000e+00> : vector<8x384xf32>
    %20 = tpu.matmul %18, %19, %cst_15 {dimension_numbers = #tpu.dot_dimension_numbers<[1], [0], [0], [1], [0, 0, 1, 1], [], []>} : vector<8x8xbf16>, vector<8x384xbf16>, vector<8x384xf32> -> vector<8x384xf32>
    %21 = arith.addf %16, %20 : vector<8x384xf32>
    %c4 = arith.constant 4 : index
    %c0_16 = arith.constant 0 : index
    %c0_17 = arith.constant 0 : index
    %22 = vector.load %arg1[%c4, %c0_16, %c0_17] : memref<9x8x8xbf16, #tpu.memory_space<vmem>>, vector<1x8x8xbf16>
    %23 = vector.shape_cast %22 : vector<1x8x8xbf16> to vector<8x8xbf16>
    %24 = vector.extract_strided_slice %2 {offsets = [0, 19], sizes = [8, 384], strides = [1, 1]} : vector<8x512xbf16> to vector<8x384xbf16>
    %cst_18 = arith.constant dense<0.000000e+00> : vector<8x384xf32>
    %25 = tpu.matmul %23, %24, %cst_18 {dimension_numbers = #tpu.dot_dimension_numbers<[1], [0], [0], [1], [0, 0, 1, 1], [], []>} : vector<8x8xbf16>, vector<8x384xbf16>, vector<8x384xf32> -> vector<8x384xf32>
    %26 = arith.addf %21, %25 : vector<8x384xf32>
    %c5 = arith.constant 5 : index
    %c0_19 = arith.constant 0 : index
    %c0_20 = arith.constant 0 : index
    %27 = vector.load %arg1[%c5, %c0_19, %c0_20] : memref<9x8x8xbf16, #tpu.memory_space<vmem>>, vector<1x8x8xbf16>
    %28 = vector.shape_cast %27 : vector<1x8x8xbf16> to vector<8x8xbf16>
    %29 = vector.extract_strided_slice %2 {offsets = [0, 20], sizes = [8, 384], strides = [1, 1]} : vector<8x512xbf16> to vector<8x384xbf16>
    %cst_21 = arith.constant dense<0.000000e+00> : vector<8x384xf32>
    %30 = tpu.matmul %28, %29, %cst_21 {dimension_numbers = #tpu.dot_dimension_numbers<[1], [0], [0], [1], [0, 0, 1, 1], [], []>} : vector<8x8xbf16>, vector<8x384xbf16>, vector<8x384xf32> -> vector<8x384xf32>
    %31 = arith.addf %26, %30 : vector<8x384xf32>
    %c6 = arith.constant 6 : index
    %c0_22 = arith.constant 0 : index
    %c0_23 = arith.constant 0 : index
    %32 = vector.load %arg1[%c6, %c0_22, %c0_23] : memref<9x8x8xbf16, #tpu.memory_space<vmem>>, vector<1x8x8xbf16>
    %33 = vector.shape_cast %32 : vector<1x8x8xbf16> to vector<8x8xbf16>
    %34 = vector.extract_strided_slice %2 {offsets = [0, 36], sizes = [8, 384], strides = [1, 1]} : vector<8x512xbf16> to vector<8x384xbf16>
    %cst_24 = arith.constant dense<0.000000e+00> : vector<8x384xf32>
    %35 = tpu.matmul %33, %34, %cst_24 {dimension_numbers = #tpu.dot_dimension_numbers<[1], [0], [0], [1], [0, 0, 1, 1], [], []>} : vector<8x8xbf16>, vector<8x384xbf16>, vector<8x384xf32> -> vector<8x384xf32>
    %36 = arith.addf %31, %35 : vector<8x384xf32>
    %c7 = arith.constant 7 : index
    %c0_25 = arith.constant 0 : index
    %c0_26 = arith.constant 0 : index
    %37 = vector.load %arg1[%c7, %c0_25, %c0_26] : memref<9x8x8xbf16, #tpu.memory_space<vmem>>, vector<1x8x8xbf16>
    %38 = vector.shape_cast %37 : vector<1x8x8xbf16> to vector<8x8xbf16>
    %39 = vector.extract_strided_slice %2 {offsets = [0, 37], sizes = [8, 384], strides = [1, 1]} : vector<8x512xbf16> to vector<8x384xbf16>
    %cst_27 = arith.constant dense<0.000000e+00> : vector<8x384xf32>
    %40 = tpu.matmul %38, %39, %cst_27 {dimension_numbers = #tpu.dot_dimension_numbers<[1], [0], [0], [1], [0, 0, 1, 1], [], []>} : vector<8x8xbf16>, vector<8x384xbf16>, vector<8x384xf32> -> vector<8x384xf32>
    %41 = arith.addf %36, %40 : vector<8x384xf32>
    %c8 = arith.constant 8 : index
    %c0_28 = arith.constant 0 : index
    %c0_29 = arith.constant 0 : index
    %42 = vector.load %arg1[%c8, %c0_28, %c0_29] : memref<9x8x8xbf16, #tpu.memory_space<vmem>>, vector<1x8x8xbf16>
    %43 = vector.shape_cast %42 : vector<1x8x8xbf16> to vector<8x8xbf16>
    %44 = vector.extract_strided_slice %2 {offsets = [0, 38], sizes = [8, 384], strides = [1, 1]} : vector<8x512xbf16> to vector<8x384xbf16>
    %cst_30 = arith.constant dense<0.000000e+00> : vector<8x384xf32>
    %45 = tpu.matmul %43, %44, %cst_30 {dimension_numbers = #tpu.dot_dimension_numbers<[1], [0], [0], [1], [0, 0, 1, 1], [], []>} : vector<8x8xbf16>, vector<8x384xbf16>, vector<8x384xf32> -> vector<8x384xf32>
    %46 = arith.addf %41, %45 : vector<8x384xf32>
    %47 = vector.broadcast %0 : vector<8x1xf32> to vector<8x384xf32>
    %48 = arith.addf %46, %47 : vector<8x384xf32>
    %c0_31 = arith.constant 0 : index
    %c0_32 = arith.constant 0 : index
    %c0_33 = arith.constant 0 : index
    %49 = vector.load %arg4[%c0_31, %c0_32, %c0_33] : memref<1x8x384xbf16, #tpu.memory_space<vmem>>, vector<1x8x384xbf16>
    %50 = vector.shape_cast %49 : vector<1x8x384xbf16> to vector<8x384xbf16>
    %51 = arith.extf %50 : vector<8x384xbf16> to vector<8x384xf32>
    %52 = arith.addf %48, %51 : vector<8x384xf32>
    %cst_34 = arith.constant 0.000000e+00 : f32
    %53 = vector.broadcast %cst_34 : f32 to vector<8x384xf32>
    %54 = arith.maximumf %52, %53 : vector<8x384xf32>
    %c0_35 = arith.constant 0 : index
    %c0_36 = arith.constant 0 : index
    %c0_37 = arith.constant 0 : index
    %55 = vector.load %arg5[%c0_35, %c0_36, %c0_37] : memref<1x8x384xf32, #tpu.memory_space<vmem>>, vector<1x8x384xf32>
    %56 = vector.shape_cast %55 : vector<1x8x384xf32> to vector<8x384xf32>
    %57 = vector.shape_cast %54 : vector<8x384xf32> to vector<1x8x384xf32>
    tpu.vector_store %arg5[%c0_35, %c0_36, %c0_37], %57 {strides = array<i32>} : memref<1x8x384xf32, #tpu.memory_space<vmem>>, vector<1x8x384xf32>,
    return
  }
  func.func @transform_0(%arg0: i32) -> (i32, i32, i32) {
    %c0_i32 = arith.constant 0 : i32
    %c0_i32_0 = arith.constant 0 : i32
    %c0_i32_1 = arith.constant 0 : i32
    %c0_i32_2 = arith.constant 0 : i32
    return %c0_i32, %c0_i32_0, %c0_i32_1 : i32, i32, i32
  }
  func.func @transform_1(%arg0: i32) -> (i32, i32) {
    %c0_i32 = arith.constant 0 : i32
    %c0_i32_0 = arith.constant 0 : i32
    %c0_i32_1 = arith.constant 0 : i32
    return %c0_i32, %c0_i32_0 : i32, i32
  }
  func.func @transform_2(%arg0: i32) -> (i32, i32, i32) {
    %c0_i32 = arith.constant 0 : i32
    %c0_i32_0 = arith.constant 0 : i32
    %c0_i32_1 = arith.constant 0 : i32
    return %arg0, %c0_i32, %c0_i32_0 : i32, i32, i32
  }
  func.func @transform_3(%arg0: i32) -> (i32, i32, i32) {
    %c0_i32 = arith.constant 0 : i32
    %c0_i32_0 = arith.constant 0 : i32
    %c0_i32_1 = arith.constant 0 : i32
    return %arg0, %c0_i32, %c0_i32_0 : i32, i32, i32
  }
  func.func @transform_4(%arg0: i32) -> (i32, i32, i32) {
    %c0_i32 = arith.constant 0 : i32
    %c0_i32_0 = arith.constant 0 : i32
    %c0_i32_1 = arith.constant 0 : i32
    return %arg0, %c0_i32, %c0_i32_0 : i32, i32, i32
  }
}

</mosaic_0001>

<bundles_post_ra>
// kernel: basic_block_forward.2
= control target key start
LH: loop header
LB: loop body
LE: loop exit
PB: predicated region body
PF: predicated region fallthrough
CT: control target
= control target key end

     0   :  { %s953_s12 = smov 0   ;;  %s1087_s0 = inlined_call_operand.vmem [shape: bf16[9,8,8], index: 0, kind: input, shape index: {}]   ;;  %s1088_s1 = inlined_call_operand.vmem [shape: f32[8,1], index: 1, kind: input, shape index: {}]   ;;  %s1089_s2 = inlined_call_operand.vmem [shape: bf16[2,8,512], index: 2, kind: input, shape index: {}]   ;;  %s1090_s3 = inlined_call_operand.vmem [shape: bf16[2,8,384], index: 3, kind: output, shape index: {}]  }
   0x1 LB: > { %s850_s13 = sadd.s32 4294967295, %s922_s12   ;;  %p854_p0 = scmp.ge.s32.totalorder %s922_s12, 1  ;;  %s922_s12 = sphi %s953_s12, %s13_s12  }
   0x2   : > { %p137_p1 = scmp.lt.s32.totalorder %s922_s12, 3 }
   0x4   : > { %p138_p2 = pnand %p854_p0, %p137_p1 }
   0x5   : > { %p161_p3 = scmp.lt.s32.totalorder (!%p138_p2), %s850_s13, 1  ;;  %s924_s18 = smov (!%p138_p2), 127  }
   0x6   : > { %141 = sbr.rel (%p138_p2) target bundleno = 387 (0x183), region = 32  ;;  %s925_s19 = smov (!%p138_p2), 126  }
   0x7   : > { %s926_s20 = smov (!%p138_p2), 110   ;;  %s927_s21 = smov (!%p138_p2), 109  }
   0x8   : > { %s928_s22 = smov (!%p138_p2), 108   ;;  %s929_s23 = smov (!%p138_p2), 92  }
   0x9   : > { %s930_s24 = smov (!%p138_p2), 91   ;;  %s931_s25 = smov (!%p138_p2), 90  }
   0xb   : > { %s1092_s13 = smov (!%p161_p3, %s850_s13), 1  ;;  %vm204_vm0 = vcmask 1043456   ;;  %v175_v11 = vld [vmem:[%s1087_s0] sm:$0xf]  ;;  %vm200_vm1 = vcmask 64512   ;;  %vm314_vm2 = vcmask 1031168  }
   0xc   : > { %s895_s14 = sshll.u32 %s1092_s13, 4  ;;  %vm196_vm3 = vcmask 1039360   ;;  %v858_v30 = vld [vmem:[%s1087_s0 + $0x4] sm:$0xf]  ;;  %vm382_vm4 = vcmask 900096   ;;  %vm450_vm5 = vcmask 891904  }
   0xd   : > { %s165_s17 = scalar_lea.vmem %s1089_s2, %s895_s14  ;;  %v865_v40 = vld [vmem:[%s1087_s0 + $0x8] sm:$0xf]  ;;  %v869_v53 = vld [vmem:[%s1087_s0 + $0xc] sm:$0xf]  ;;  %vm518_vm6 = vcmask 883712   ;;  %vm586_vm7 = vcmask 752640  }
   0xe   : > { %v174_v0 = vld [vmem:[%s165_s17 + $0x8] sm:$0xff]  ;;  %v173_v1 = vld [vmem:[%s165_s17] sm:$0xff]  ;;  %vm654_vm8 = vcmask 744448   ;;  %vm722_vm9 = vcmask 736256  }
   0xf   : > { %v182_v2 = vunpack.c.l.b16 %v174_v0  ;;  %v180_v3 = vunpack.c.l.b16 %v173_v1  ;;  %v183_v6 = vunpack.c.h.b16 %v174_v0  ;;  %v181_v7 = vunpack.c.h.b16 %v173_v1 }
  0x11   : > { %v967_v4 = vpack.c.b16 %v182_v2, %v182_v2  ;;  %v184_v5 = vpack.c.b16 %v180_v3, %v180_v3  ;;  %v187_v8 = vpack.c.b16 %v183_v6, %v183_v6  ;;  %v185_v9 = vpack.c.b16 %v181_v7, %v181_v7 }
  0x13   : > { %192 = vrot.lane.b32.xlu0 %v967_v4, %s924_s18  ;;  %188 = vrot.lane.b32.xlu1 %v184_v5, %s924_s18  ;;  %v257_v10 = vsel %vm204_vm0, %v184_v5, 0  ;;  %v260_v25 = vsel %vm204_vm0, %v185_v9, 0  ;;  %v263_v29 = vsel %vm204_vm0, %v967_v4, 0 }
  0x14   : > { %306 = vrot.lane.b32.xlu2 %v184_v5, %s925_s19  ;;  %272 = vmatpush.bf16.msra.mxu3 %v257_v10 }
  0x17   : > { %862 = vmatmul.msk.bf16.vlgmr.msra.gmra.mxu3 %vm200_vm1, %v175_v11 }
  0x1b   : > { %194 = vrot.lane.b32.xlu0 %v187_v8, %s924_s18  ;;  %190 = vrot.lane.b32.xlu1 %v185_v9, %s924_s18 }
  0x1c   : > { %308 = vrot.lane.b32.xlu2 %v185_v9, %s925_s19 }
  0x23   : > { %310 = vrot.lane.b32.xlu0 %v967_v4, %s925_s19  ;;  %376 = vrot.lane.b32.xlu1 %v185_v9, %s926_s20 }
  0x24   : > { %378 = vrot.lane.b32.xlu2 %v967_v4, %s926_s20 }
  0x2b   : > { %312 = vrot.lane.b32.xlu0 %v187_v8, %s925_s19  ;;  %374 = vrot.lane.b32.xlu1 %v184_v5, %s926_s20 }
  0x2c   : > { %380 = vrot.lane.b32.xlu2 %v187_v8, %s926_s20 }
  0x33   : > { %446 = vrot.lane.b32.xlu0 %v967_v4, %s927_s21  ;;  %448 = vrot.lane.b32.xlu1 %v187_v8, %s927_s21 }
  0x34   : > { %442 = vrot.lane.b32.xlu2 %v184_v5, %s927_s21 }
  0x3b   : > { %444 = vrot.lane.b32.xlu0 %v185_v9, %s927_s21  ;;  %510 = vrot.lane.b32.xlu1 %v184_v5, %s928_s22  ;;  %s896_s21 = smul.u32 12, %s1092_s13 }
  0x3c   : > { %512 = vrot.lane.b32.xlu2 %v185_v9, %s928_s22 }
  0x43   : > { %578 = vrot.lane.b32.xlu0 %v184_v5, %s929_s23  ;;  %580 = vrot.lane.b32.xlu1 %v185_v9, %s929_s23 }
  0x44   : > { %514 = vrot.lane.b32.xlu2 %v967_v4, %s928_s22 }
  0x4b   : > { %516 = vrot.lane.b32.xlu0 %v187_v8, %s928_s22  ;;  %582 = vrot.lane.b32.xlu1 %v967_v4, %s929_s23 }
  0x4c   : > { %648 = vrot.lane.b32.xlu2 %v185_v9, %s930_s24 }
  0x53   : > { %650 = vrot.lane.b32.xlu0 %v967_v4, %s930_s24  ;;  %584 = vrot.lane.b32.xlu1 %v187_v8, %s929_s23 }
  0x54   : > { %646 = vrot.lane.b32.xlu2 %v184_v5, %s930_s24 }
  0x5b   : > { %652 = vrot.lane.b32.xlu0 %v187_v8, %s930_s24  ;;  %718 = vrot.lane.b32.xlu1 %v967_v4, %s931_s25  ;;  %s170_s24 = scalar_lea.vmem %s1090_s3, %s896_s21 }
  0x5c   : > { %720 = vrot.lane.b32.xlu2 %v187_v8, %s931_s25 }
  0x63   : > { %716 = vrot.lane.b32.xlu1 %v185_v9, %s931_s25  ;;  %714 = vrot.lane.b32.xlu0 %v184_v5, %s931_s25  ;;  %v877_v5 = vld [vmem:[%s1087_s0 + $0x14] sm:$0xf] }
  0x6e   : > { %v307_v12 = vpop.permute.xlu2 %306 }
  0x76   : > { %v309_v13 = vpop.permute.xlu2 %308 }
  0x77   : > { %v315_v17 = vsel %vm314_vm2, %v307_v12, %v309_v13 }
  0x78   : > { %v322_v21 = vsel %vm204_vm0, %v315_v17, 0 }
  0x7e   : > { %v379_v14 = vpop.permute.xlu2 %378 }
  0x85   : > { %v193_v15 = vpop.permute.xlu0 %192  ;;  %v189_v16 = vpop.permute.xlu1 %188 }
  0x86   : > { %v381_v18 = vpop.permute.xlu2 %380 }
  0x87   : > { %v385_v31 = vsel %vm382_vm4, %v379_v14, %v381_v18 }
  0x88   : > { %v396_v37 = vsel %vm204_vm0, %v385_v31, 0 }
  0x8d   : > { %v195_v19 = vpop.permute.xlu0 %194  ;;  %v191_v20 = vpop.permute.xlu1 %190 }
  0x8e   : > { %v197_v22 = vsel %vm196_vm3, %v189_v16, %v191_v20  ;;  %v198_v23 = vsel %vm196_vm3, %v191_v20, %v193_v15  ;;  %v199_v24 = vsel %vm196_vm3, %v193_v15, %v195_v19  ;;  %v443_v32 = vpop.permute.xlu2 %442 }
  0x8f   : > { %v206_v26 = vsel %vm204_vm0, %v197_v22, 0  ;;  %v209_v27 = vsel %vm204_vm0, %v198_v23, 0  ;;  %v212_v28 = vsel %vm204_vm0, %v199_v24, 0  ;;  %v881_v22 = vld [vmem:[%s1087_s0 + $0x18] sm:$0xf] }
  0x90   : > { %221 = vmatpush.bf16.msra.mxu0 %v206_v26  ;;  %234 = vmatpush.bf16.msra.mxu1 %v209_v27 }
  0x91   : > { %247 = vmatpush.bf16.msra.mxu2 %v212_v28 }
  0x93   : > { %859 = vmatmul.msk.bf16.vlgmr.msra.gmra.mxu0 %vm200_vm1, %v858_v30  ;;  %860 = vmatmul.msk.bf16.vlgmr.msra.gmra.mxu1 %vm200_vm1, %v858_v30 }
  0x94   : > { %285 = vmatpush.bf16.msrb.mxu0 %v260_v25  ;;  %298 = vmatpush.bf16.msrb.mxu1 %v263_v29 }
  0x95   : > { %337 = vmatpush.bf16.msrb.mxu2 %v322_v21  ;;  %v311_v33 = vpop.permute.xlu0 %310  ;;  %v377_v34 = vpop.permute.xlu1 %376 }
  0x96   : > { %861 = vmatmul.msk.bf16.vlgmr.msra.gmra.mxu2 %vm200_vm1, %v858_v30  ;;  %v384_v35 = vsel %vm382_vm4, %v377_v34, %v379_v14  ;;  %v316_v36 = vsel %vm314_vm2, %v309_v13, %v311_v33  ;;  %v513_v47 = vpop.permute.xlu2 %512  ;;  %v873_v14 = vld [vmem:[%s1087_s0 + $0x10] sm:$0xf] }
  0x97   : > { %v393_v38 = vsel %vm204_vm0, %v384_v35, 0  ;;  %v325_v39 = vsel %vm204_vm0, %v316_v36, 0  ;;  %v885_v36 = vld [vmem:[%s1087_s0 + $0x1c] sm:$0xf] }
  0x98   : > { %350 = vmatpush.bf16.msrb.mxu3 %v325_v39  ;;  %v172_v39 = vld [vmem:[%s1088_s1] sm:$0xff] }
  0x99   : > { %418 = vmatpush.bf16.msra.mxu2 %v393_v38 }
  0x9a   : > { %v274_v38 = vpop.f32.mrf.mxu3 }
  0x9b   : > { %867 = vmatmul.msk.bf16.vlgmr.msrb.gmra.mxu3 %vm200_vm1, %v865_v40 }
  0x9c   : > { %431 = vmatpush.bf16.msra.mxu3 %v396_v37  ;;  %v889_v37 = vld [vmem:[%s1087_s0 + $0x20] sm:$0xf] }
  0x9d   : > { %v313_v41 = vpop.permute.xlu0 %312  ;;  %v375_v42 = vpop.permute.xlu1 %374 }
  0x9e   : > { %v317_v43 = vsel %vm314_vm2, %v311_v33, %v313_v41  ;;  %v383_v44 = vsel %vm382_vm4, %v375_v42, %v377_v34  ;;  %v515_v52 = vpop.permute.xlu2 %514 }
  0x9f   : > { %v328_v45 = vsel %vm204_vm0, %v317_v43, 0  ;;  %v390_v46 = vsel %vm204_vm0, %v383_v44, 0  ;;  %v520_v59 = vsel %vm518_vm6, %v513_v47, %v515_v52 }
  0xa0   : > { %363 = vmatpush.bf16.msra.mxu0 %v328_v45  ;;  %405 = vmatpush.bf16.msra.mxu1 %v390_v46  ;;  %v529_v63 = vsel %vm204_vm0, %v520_v59, 0 }
  0xa2   : > { %v276_v41 = vpop.f32.mrf.mxu3 }
  0xa3   : > { %863 = vmatmul.msk.bf16.vlgmr.msrb.gmra.mxu0 %vm200_vm1, %v175_v11  ;;  %864 = vmatmul.msk.bf16.vlgmr.msrb.gmra.mxu1 %vm200_vm1, %v175_v11 }
  0xa5   : > { %v447_v48 = vpop.permute.xlu0 %446  ;;  %v449_v49 = vpop.permute.xlu1 %448 }
  0xa6   : > { %866 = vmatmul.msk.bf16.vlgmr.msrb.gmra.mxu2 %vm200_vm1, %v865_v40  ;;  %v453_v50 = vsel %vm450_vm5, %v447_v48, %v449_v49  ;;  %v649_v0 = vpop.permute.xlu2 %648 }
  0xa7   : > { %v464_v51 = vsel %vm204_vm0, %v453_v50, 0 }
  0xa8   : > { %499 = vmatpush.bf16.msrb.mxu2 %v464_v51 }
  0xab   : > { %872 = vmatmul.msk.bf16.vlgmr.msra.gmra.mxu3 %vm200_vm1, %v869_v53 }
  0xad   : > { %v445_v54 = vpop.permute.xlu0 %444  ;;  %v511_v55 = vpop.permute.xlu1 %510 }
  0xae   : > { %v452_v56 = vsel %vm450_vm5, %v445_v54, %v447_v48  ;;  %v451_v57 = vsel %vm450_vm5, %v443_v32, %v445_v54  ;;  %v519_v58 = vsel %vm518_vm6, %v511_v55, %v513_v47  ;;  %v647_v6 = vpop.permute.xlu2 %646 }
  0xaf   : > { %v461_v60 = vsel %vm204_vm0, %v452_v56, 0  ;;  %v458_v61 = vsel %vm204_vm0, %v451_v57, 0  ;;  %v526_v62 = vsel %vm204_vm0, %v519_v58, 0  ;;  %v655_v11 = vsel %vm654_vm8, %v647_v6, %v649_v0 }
  0xb0   : > { %486 = vmatpush.bf16.msrb.mxu1 %v461_v60  ;;  %473 = vmatpush.bf16.msrb.mxu0 %v458_v61  ;;  %v662_v15 = vsel %vm204_vm0, %v655_v11, 0 }
  0xb1   : > { %541 = vmatpush.bf16.msrb.mxu3 %v526_v62 }
  0xb3   : > { %868 = vmatmul.msk.bf16.vlgmr.msra.gmra.mxu0 %vm200_vm1, %v865_v40  ;;  %870 = vmatmul.msk.bf16.vlgmr.msra.gmra.mxu1 %vm200_vm1, %v869_v53  ;;  %v932_v40 = vmov 0  }
  0xb4   : > { %554 = vmatpush.bf16.msra.mxu0 %v529_v63  ;;  %914 = vset.pattern.permute.xlu2 %v932_v40 }
  0xb5   : > { %v579_v1 = vpop.permute.xlu0 %578  ;;  %v581_v2 = vpop.permute.xlu1 %580  ;;  %915 = vset.pattern.permute.xlu0 %v932_v40  ;;  %782 = vperm.xlu2 %914, %v172_v39  }
  0xb6   : > { %871 = vmatmul.msk.bf16.vlgmr.msra.gmra.mxu2 %vm200_vm1, %v869_v53  ;;  %v587_v3 = vsel %vm586_vm7, %v579_v1, %v581_v2  ;;  %v721_v23 = vpop.permute.xlu2 %720 }
  0xb7   : > { %v594_v4 = vsel %vm204_vm0, %v587_v3, 0 }
  0xb8   : > { %609 = vmatpush.bf16.msra.mxu2 %v594_v4 }
  0xbb   : > { %878 = vmatmul.msk.bf16.vlgmr.msrb.gmra.mxu3 %vm200_vm1, %v877_v5 }
  0xbd   : > { %v517_v7 = vpop.permute.xlu0 %516  ;;  %v583_v8 = vpop.permute.xlu1 %582 }
  0xbe   : > { %v521_v9 = vsel %vm518_vm6, %v515_v52, %v517_v7  ;;  %v588_v10 = vsel %vm586_vm7, %v581_v2, %v583_v8 }
  0xbf   : > { %v532_v12 = vsel %vm204_vm0, %v521_v9, 0  ;;  %v597_v13 = vsel %vm204_vm0, %v588_v10, 0 }
  0xc0   : > { %622 = vmatpush.bf16.msra.mxu3 %v597_v13  ;;  %567 = vmatpush.bf16.msra.mxu1 %v532_v12 }
  0xc3   : > { %874 = vmatmul.msk.bf16.vlgmr.msrb.gmra.mxu0 %vm200_vm1, %v873_v14  ;;  %875 = vmatmul.msk.bf16.vlgmr.msrb.gmra.mxu1 %vm200_vm1, %v873_v14 }
  0xc4   : > { %677 = vmatpush.bf16.msrb.mxu1 %v662_v15 }
  0xc5   : > { %v651_v16 = vpop.permute.xlu0 %650  ;;  %v585_v17 = vpop.permute.xlu1 %584 }
  0xc6   : > { %876 = vmatmul.msk.bf16.vlgmr.msrb.gmra.mxu2 %vm200_vm1, %v873_v14  ;;  %v656_v18 = vsel %vm654_vm8, %v649_v0, %v651_v16  ;;  %v589_v19 = vsel %vm586_vm7, %v583_v8, %v585_v17 }
  0xc7   : > { %v665_v20 = vsel %vm204_vm0, %v656_v18, 0  ;;  %v600_v21 = vsel %vm204_vm0, %v589_v19, 0 }
  0xc8   : > { %635 = vmatpush.bf16.msrb.mxu0 %v600_v21  ;;  %690 = vmatpush.bf16.msrb.mxu2 %v665_v20 }
  0xcb   : > { %883 = vmatmul.msk.bf16.vlgmr.msra.gmra.mxu3 %vm200_vm1, %v881_v22 }
  0xcd   : > { %v653_v24 = vpop.permute.xlu0 %652  ;;  %v719_v25 = vpop.permute.xlu1 %718 }
  0xce   : > { %v657_v26 = vsel %vm654_vm8, %v651_v16, %v653_v24  ;;  %v725_v28 = vsel %vm722_vm9, %v719_v25, %v721_v23 }
  0xcf   : > { %v668_v27 = vsel %vm204_vm0, %v657_v26, 0  ;;  %v736_v29 = vsel %vm204_vm0, %v725_v28, 0 }
  0xd0   : > { %703 = vmatpush.bf16.msrb.mxu3 %v668_v27 }
  0xd3   : > { %879 = vmatmul.msk.bf16.vlgmr.msra.gmra.mxu0 %vm200_vm1, %v877_v5  ;;  %880 = vmatmul.msk.bf16.vlgmr.msra.gmra.mxu1 %vm200_vm1, %v877_v5 }
  0xd5   : > { %v717_v30 = vpop.permute.xlu1 %716  ;;  %v715_v31 = vpop.permute.xlu0 %714 }
  0xd6   : > { %882 = vmatmul.msk.bf16.vlgmr.msra.gmra.mxu2 %vm200_vm1, %v881_v22  ;;  %v724_v32 = vsel %vm722_vm9, %v717_v30, %v719_v25  ;;  %v723_v33 = vsel %vm722_vm9, %v715_v31, %v717_v30 }
  0xd7   : > { %771 = vmatpush.bf16.msra.mxu2 %v736_v29  ;;  %v733_v34 = vsel %vm204_vm0, %v724_v32, 0  ;;  %v730_v35 = vsel %vm204_vm0, %v723_v33, 0 }
  0xd8   : > { %758 = vmatpush.bf16.msra.mxu1 %v733_v34  ;;  %745 = vmatpush.bf16.msra.mxu0 %v730_v35 }
  0xdb   : > { %888 = vmatmul.msk.bf16.vlgmr.msrb.gmra.mxu3 %vm200_vm1, %v885_v36 }
  0xe3   : > { %884 = vmatmul.msk.bf16.vlgmr.msrb.gmra.mxu0 %vm200_vm1, %v881_v22  ;;  %886 = vmatmul.msk.bf16.vlgmr.msrb.gmra.mxu1 %vm200_vm1, %v885_v36 }
  0xe6   : > { %887 = vmatmul.msk.bf16.vlgmr.msrb.gmra.mxu2 %vm200_vm1, %v885_v36 }
  0xf3   : > { %890 = vmatmul.msk.bf16.vlgmr.msra.gmra.mxu0 %vm200_vm1, %v889_v37  ;;  %891 = vmatmul.msk.bf16.vlgmr.msra.gmra.mxu1 %vm200_vm1, %v889_v37 }
  0xf6   : > { %892 = vmatmul.msk.bf16.vlgmr.msra.gmra.mxu2 %vm200_vm1, %v889_v37 }
 0x110   : > { %v223_v42 = vpop.f32.mrf.mxu0  ;;  %v236_v43 = vpop.f32.mrf.mxu1 }
 0x111   : > { %v275_v44 = vadd.f32 %v274_v38, %v223_v42  ;;  %v783_v42 = vpop.permute.xlu2 %782 }
 0x118   : > { %v225_v46 = vpop.f32.mrf.mxu0  ;;  %v238_v47 = vpop.f32.mrf.mxu1 }
 0x119   : > { %v249_v45 = vpop.f32.mrf.mxu2 }
 0x11e   : > { %v352_v48 = vpop.f32.mrf.mxu3 }
 0x120   : > { %v287_v50 = vpop.f32.mrf.mxu0  ;;  %v300_v51 = vpop.f32.mrf.mxu1 }
 0x121   : > { %v251_v49 = vpop.f32.mrf.mxu2  ;;  %v288_v52 = vadd.f32 %v287_v50, %v236_v43  ;;  %v301_v53 = vadd.f32 %v300_v51, %v249_v45 }
 0x123   : > { %v370_v54 = vadd.f32 %v352_v48, %v288_v52 }
 0x126   : > { %v354_v55 = vpop.f32.mrf.mxu3 }
 0x128   : > { %v289_v57 = vpop.f32.mrf.mxu0  ;;  %v302_v58 = vpop.f32.mrf.mxu1 }
 0x129   : > { %v339_v56 = vpop.f32.mrf.mxu2 }
 0x12a   : > { %v369_v23 = vadd.f32 %v339_v56, %v275_v44 }
 0x12e   : > { %v433_v59 = vpop.f32.mrf.mxu3 }
 0x130   : > { %v365_v61 = vpop.f32.mrf.mxu0  ;;  %v407_v62 = vpop.f32.mrf.mxu1 }
 0x131   : > { %v341_v60 = vpop.f32.mrf.mxu2  ;;  %v437_v24 = vadd.f32 %v407_v62, %v369_v23  ;;  %v371_v30 = vadd.f32 %v365_v61, %v301_v53 }
 0x133   : > { %v439_v35 = vadd.f32 %v433_v59, %v371_v30 }
 0x136   : > { %v435_v63 = vpop.f32.mrf.mxu3 }
 0x138   : > { %v367_v1 = vpop.f32.mrf.mxu0  ;;  %v409_v2 = vpop.f32.mrf.mxu1 }
 0x139   : > { %v420_v0 = vpop.f32.mrf.mxu2 }
 0x13a   : > { %v438_v25 = vadd.f32 %v420_v0, %v370_v54 }
 0x13e   : > { %v543_v3 = vpop.f32.mrf.mxu3 }
 0x140   : > { %v475_v5 = vpop.f32.mrf.mxu0  ;;  %v488_v6 = vpop.f32.mrf.mxu1 }
 0x141   : > { %v422_v4 = vpop.f32.mrf.mxu2  ;;  %v505_v27 = vadd.f32 %v475_v5, %v437_v24  ;;  %v506_v28 = vadd.f32 %v488_v6, %v438_v25 }
 0x143   : > { %v573_v34 = vadd.f32 %v543_v3, %v505_v27 }
 0x146   : > { %v545_v7 = vpop.f32.mrf.mxu3 }
 0x148   : > { %v477_v9 = vpop.f32.mrf.mxu0  ;;  %v490_v10 = vpop.f32.mrf.mxu1 }
 0x149   : > { %v501_v8 = vpop.f32.mrf.mxu2 }
 0x14a   : > { %v507_v38 = vadd.f32 %v501_v8, %v439_v35 }
 0x14e   : > { %v624_v11 = vpop.f32.mrf.mxu3 }
 0x150   : > { %v556_v13 = vpop.f32.mrf.mxu0  ;;  %v569_v14 = vpop.f32.mrf.mxu1 }
 0x151   : > { %v503_v12 = vpop.f32.mrf.mxu2  ;;  %v574_v33 = vadd.f32 %v556_v13, %v506_v28  ;;  %v575_v43 = vadd.f32 %v569_v14, %v507_v38 }
 0x153   : > { %v642_v36 = vadd.f32 %v624_v11, %v574_v33 }
 0x156   : > { %v626_v15 = vpop.f32.mrf.mxu3 }
 0x158   : > { %v558_v17 = vpop.f32.mrf.mxu0  ;;  %v571_v18 = vpop.f32.mrf.mxu1 }
 0x159   : > { %v611_v16 = vpop.f32.mrf.mxu2 }
 0x15a   : > { %v641_v37 = vadd.f32 %v611_v16, %v573_v34 }
 0x15e   : > { %v705_v19 = vpop.f32.mrf.mxu3 }
 0x160   : > { %v637_v21 = vpop.f32.mrf.mxu0  ;;  %v679_v22 = vpop.f32.mrf.mxu1 }
 0x161   : > { %v613_v20 = vpop.f32.mrf.mxu2  ;;  %v709_v39 = vadd.f32 %v679_v22, %v641_v37  ;;  %v643_v48 = vadd.f32 %v637_v21, %v575_v43 }
 0x163   : > { %v711_v53 = vadd.f32 %v705_v19, %v643_v48 }
 0x166   : > { %v707_v26 = vpop.f32.mrf.mxu3 }
 0x168   : > { %v639_v31 = vpop.f32.mrf.mxu0  ;;  %v681_v32 = vpop.f32.mrf.mxu1 }
 0x169   : > { %v692_v29 = vpop.f32.mrf.mxu2 }
 0x16a   : > { %v710_v40 = vadd.f32 %v692_v29, %v642_v36 }
 0x170   : > { %v747_v44 = vpop.f32.mrf.mxu0  ;;  %v760_v45 = vpop.f32.mrf.mxu1 }
 0x171   : > { %v694_v41 = vpop.f32.mrf.mxu2  ;;  %v777_v46 = vadd.f32 %v747_v44, %v709_v39  ;;  %v778_v47 = vadd.f32 %v760_v45, %v710_v40 }
 0x173   : > { %v785_v49 = vadd.f32 %v783_v42, %v777_v46  ;;  %v786_v50 = vadd.f32 %v783_v42, %v778_v47 }
 0x175   : > { %v788_v51 = vmax.f32 %v785_v49, 0.0  ;;  %v789_v52 = vmax.f32 %v786_v50, 0.0 }
 0x177   : > { %v791_v54 = vpack.c.bf16 %v789_v52, %v788_v51 }
 0x178   : > { %v749_v57 = vpop.f32.mrf.mxu0  ;;  %v762_v58 = vpop.f32.mrf.mxu1 }
 0x179   : > { %v773_v55 = vpop.f32.mrf.mxu2  ;;  %793 = vst [vmem:[%s170_s24] sm:$0xff] %v791_v54 }
 0x17a   : > { %v779_v56 = vadd.f32 %v773_v55, %v711_v53 }
 0x17c   : > { %v787_v59 = vadd.f32 %v783_v42, %v779_v56 }
 0x17e   : > { %v790_v60 = vmax.f32 %v787_v59, 0.0 }
 0x180   : > { %v792_v61 = vpack.c.bf16 %v790_v60, %v790_v60 }
 0x181   : > { %v775_v62 = vpop.f32.mrf.mxu2 }
 0x182   : > { %794 = vst [vmem:[%s170_s24 + $0x8] sm:$0xf] %v792_v61 }
 0x183 PF: > { %s13_s12 = sadd.s32 1, %s922_s12  }
 0x184   : > { %p10_p4 = scmp.ge.s32.totalorder %s13_s12, 4  }
 0x186   :  { %12 = sbr.rel (!%p10_p4) target bundleno = 1 (0x1), region = 70 }

// kernel: basic_block_forward.3
= control target key start
LH: loop header
LB: loop body
LE: loop exit
PB: predicated region body
PF: predicated region fallthrough
CT: control target
= control target key end

     0   :  { %s1026_s15 = smov 0   ;;  %s1164_s0 = inlined_call_operand.vmem [shape: bf16[9,8,8], index: 0, kind: input, shape index: {}]   ;;  %s1165_s1 = inlined_call_operand.vmem [shape: f32[8,1], index: 1, kind: input, shape index: {}]   ;;  %s1166_s2 = inlined_call_operand.vmem [shape: bf16[2,8,512], index: 2, kind: input, shape index: {}]   ;;  %s1167_s3 = inlined_call_operand.vmem [shape: bf16[2,8,384], index: 3, kind: input, shape index: {}]   ;;  %s1168_s4 = inlined_call_operand.vmem [shape: f32[2,8,384], index: 4, kind: output, shape index: {}]  }
   0x1 LB: > { %s916_s16 = sadd.s32 4294967295, %s990_s15   ;;  %p920_p0 = scmp.ge.s32.totalorder %s990_s15, 1  ;;  %s990_s15 = sphi %s1026_s15, %s14_s15  }
   0x2   : > { %p172_p1 = scmp.lt.s32.totalorder %s990_s15, 3 }
   0x4   : > { %p173_p2 = pnand %p920_p0, %p172_p1 }
   0x5   : > { %p203_p3 = scmp.lt.s32.totalorder (!%p173_p2), %s916_s16, 1  ;;  %s992_s21 = smov (!%p173_p2), 127  }
   0x6   : > { %176 = sbr.rel (%p173_p2) target bundleno = 387 (0x183), region = 36  ;;  %s993_s22 = smov (!%p173_p2), 126  }
   0x7   : > { %s994_s23 = smov (!%p173_p2), 110   ;;  %s995_s24 = smov (!%p173_p2), 109  }
   0x8   : > { %s996_s25 = smov (!%p173_p2), 108   ;;  %s997_s26 = smov (!%p173_p2), 92  }
   0x9   : > { %s998_s27 = smov (!%p173_p2), 91   ;;  %s999_s28 = smov (!%p173_p2), 90  }
   0xb   : > { %s1170_s16 = smov (!%p203_p3, %s916_s16), 1  ;;  %vm251_vm0 = vcmask 1043456   ;;  %v222_v11 = vld [vmem:[%s1164_s0] sm:$0xf]  ;;  %vm247_vm1 = vcmask 64512   ;;  %vm361_vm2 = vcmask 1031168  }
   0xc   : > { %s962_s17 = sshll.u32 %s1170_s16, 4  ;;  %vm243_vm3 = vcmask 1039360   ;;  %v925_v30 = vld [vmem:[%s1164_s0 + $0x4] sm:$0xf]  ;;  %vm429_vm4 = vcmask 900096   ;;  %vm497_vm5 = vcmask 891904  }
   0xd   : > { %s207_s20 = scalar_lea.vmem %s1166_s2, %s962_s17  ;;  %v932_v40 = vld [vmem:[%s1164_s0 + $0x8] sm:$0xf]  ;;  %v936_v53 = vld [vmem:[%s1164_s0 + $0xc] sm:$0xf]  ;;  %vm565_vm6 = vcmask 883712   ;;  %vm633_vm7 = vcmask 752640  }
   0xe   : > { %v221_v0 = vld [vmem:[%s207_s20 + $0x8] sm:$0xff]  ;;  %v220_v1 = vld [vmem:[%s207_s20] sm:$0xff]  ;;  %vm701_vm8 = vcmask 744448   ;;  %vm769_vm9 = vcmask 736256   ;;  %s964_s29 = smul.u32 24, %s1170_s16 }
   0xf   : > { %v229_v2 = vunpack.c.l.b16 %v221_v0  ;;  %v227_v3 = vunpack.c.l.b16 %v220_v1  ;;  %v230_v6 = vunpack.c.h.b16 %v221_v0  ;;  %v228_v7 = vunpack.c.h.b16 %v220_v1 }
  0x10   : > { %s217_s6 = scalar_lea.vmem %s1168_s4, %s964_s29 }
  0x11   : > { %v1040_v4 = vpack.c.b16 %v229_v2, %v229_v2  ;;  %v231_v5 = vpack.c.b16 %v227_v3, %v227_v3  ;;  %v234_v8 = vpack.c.b16 %v230_v6, %v230_v6  ;;  %v232_v9 = vpack.c.b16 %v228_v7, %v228_v7 }
  0x13   : > { %239 = vrot.lane.b32.xlu0 %v1040_v4, %s992_s21  ;;  %235 = vrot.lane.b32.xlu1 %v231_v5, %s992_s21  ;;  %v304_v10 = vsel %vm251_vm0, %v231_v5, 0  ;;  %v307_v25 = vsel %vm251_vm0, %v232_v9, 0  ;;  %v310_v29 = vsel %vm251_vm0, %v1040_v4, 0 }
  0x14   : > { %353 = vrot.lane.b32.xlu2 %v231_v5, %s993_s22  ;;  %319 = vmatpush.bf16.msra.mxu3 %v304_v10 }
  0x17   : > { %929 = vmatmul.msk.bf16.vlgmr.msra.gmra.mxu3 %vm247_vm1, %v222_v11 }
  0x1b   : > { %241 = vrot.lane.b32.xlu0 %v234_v8, %s992_s21  ;;  %237 = vrot.lane.b32.xlu1 %v232_v9, %s992_s21 }
  0x1c   : > { %355 = vrot.lane.b32.xlu2 %v232_v9, %s993_s22 }
  0x23   : > { %357 = vrot.lane.b32.xlu0 %v1040_v4, %s993_s22  ;;  %423 = vrot.lane.b32.xlu1 %v232_v9, %s994_s23 }
  0x24   : > { %425 = vrot.lane.b32.xlu2 %v1040_v4, %s994_s23 }
  0x2b   : > { %359 = vrot.lane.b32.xlu0 %v234_v8, %s993_s22  ;;  %421 = vrot.lane.b32.xlu1 %v231_v5, %s994_s23 }
  0x2c   : > { %427 = vrot.lane.b32.xlu2 %v234_v8, %s994_s23 }
  0x33   : > { %493 = vrot.lane.b32.xlu0 %v1040_v4, %s995_s24  ;;  %495 = vrot.lane.b32.xlu1 %v234_v8, %s995_s24 }
  0x34   : > { %489 = vrot.lane.b32.xlu2 %v231_v5, %s995_s24 }
  0x3b   : > { %491 = vrot.lane.b32.xlu0 %v232_v9, %s995_s24  ;;  %557 = vrot.lane.b32.xlu1 %v231_v5, %s996_s25 }
  0x3c   : > { %559 = vrot.lane.b32.xlu2 %v232_v9, %s996_s25 }
  0x43   : > { %625 = vrot.lane.b32.xlu0 %v231_v5, %s997_s26  ;;  %627 = vrot.lane.b32.xlu1 %v232_v9, %s997_s26 }
  0x44   : > { %561 = vrot.lane.b32.xlu2 %v1040_v4, %s996_s25 }
  0x4b   : > { %563 = vrot.lane.b32.xlu0 %v234_v8, %s996_s25  ;;  %629 = vrot.lane.b32.xlu1 %v1040_v4, %s997_s26  ;;  %s963_s25 = smul.u32 12, %s1170_s16 }
  0x4c   : > { %695 = vrot.lane.b32.xlu2 %v232_v9, %s998_s27 }
  0x53   : > { %697 = vrot.lane.b32.xlu0 %v1040_v4, %s998_s27  ;;  %631 = vrot.lane.b32.xlu1 %v234_v8, %s997_s26 }
  0x54   : > { %693 = vrot.lane.b32.xlu2 %v231_v5, %s998_s27 }
  0x5b   : > { %699 = vrot.lane.b32.xlu0 %v234_v8, %s998_s27  ;;  %765 = vrot.lane.b32.xlu1 %v1040_v4, %s999_s28 }
  0x5c   : > { %767 = vrot.lane.b32.xlu2 %v234_v8, %s999_s28 }
  0x63   : > { %763 = vrot.lane.b32.xlu1 %v232_v9, %s999_s28  ;;  %761 = vrot.lane.b32.xlu0 %v231_v5, %s999_s28  ;;  %v944_v5 = vld [vmem:[%s1164_s0 + $0x14] sm:$0xf]  ;;  %s212_s28 = scalar_lea.vmem %s1167_s3, %s963_s25 }
  0x6e   : > { %v354_v12 = vpop.permute.xlu2 %353 }
  0x76   : > { %v356_v13 = vpop.permute.xlu2 %355 }
  0x77   : > { %v362_v17 = vsel %vm361_vm2, %v354_v12, %v356_v13 }
  0x78   : > { %v369_v21 = vsel %vm251_vm0, %v362_v17, 0 }
  0x7e   : > { %v426_v14 = vpop.permute.xlu2 %425 }
  0x85   : > { %v240_v15 = vpop.permute.xlu0 %239  ;;  %v236_v16 = vpop.permute.xlu1 %235 }
  0x86   : > { %v428_v18 = vpop.permute.xlu2 %427 }
  0x87   : > { %v432_v31 = vsel %vm429_vm4, %v426_v14, %v428_v18 }
  0x88   : > { %v443_v37 = vsel %vm251_vm0, %v432_v31, 0 }
  0x8d   : > { %v242_v19 = vpop.permute.xlu0 %241  ;;  %v238_v20 = vpop.permute.xlu1 %237 }
  0x8e   : > { %v244_v22 = vsel %vm243_vm3, %v236_v16, %v238_v20  ;;  %v245_v23 = vsel %vm243_vm3, %v238_v20, %v240_v15  ;;  %v246_v24 = vsel %vm243_vm3, %v240_v15, %v242_v19  ;;  %v490_v32 = vpop.permute.xlu2 %489 }
  0x8f   : > { %v253_v26 = vsel %vm251_vm0, %v244_v22, 0  ;;  %v256_v27 = vsel %vm251_vm0, %v245_v23, 0  ;;  %v259_v28 = vsel %vm251_vm0, %v246_v24, 0  ;;  %v948_v22 = vld [vmem:[%s1164_s0 + $0x18] sm:$0xf] }
  0x90   : > { %268 = vmatpush.bf16.msra.mxu0 %v253_v26  ;;  %281 = vmatpush.bf16.msra.mxu1 %v256_v27 }
  0x91   : > { %294 = vmatpush.bf16.msra.mxu2 %v259_v28 }
  0x93   : > { %926 = vmatmul.msk.bf16.vlgmr.msra.gmra.mxu0 %vm247_vm1, %v925_v30  ;;  %927 = vmatmul.msk.bf16.vlgmr.msra.gmra.mxu1 %vm247_vm1, %v925_v30 }
  0x94   : > { %332 = vmatpush.bf16.msrb.mxu0 %v307_v25  ;;  %345 = vmatpush.bf16.msrb.mxu1 %v310_v29 }
  0x95   : > { %384 = vmatpush.bf16.msrb.mxu2 %v369_v21  ;;  %v358_v33 = vpop.permute.xlu0 %357  ;;  %v424_v34 = vpop.permute.xlu1 %423 }
  0x96   : > { %928 = vmatmul.msk.bf16.vlgmr.msra.gmra.mxu2 %vm247_vm1, %v925_v30  ;;  %v431_v35 = vsel %vm429_vm4, %v424_v34, %v426_v14  ;;  %v363_v36 = vsel %vm361_vm2, %v356_v13, %v358_v33  ;;  %v560_v47 = vpop.permute.xlu2 %559  ;;  %v940_v14 = vld [vmem:[%s1164_s0 + $0x10] sm:$0xf] }
  0x97   : > { %v440_v38 = vsel %vm251_vm0, %v431_v35, 0  ;;  %v372_v39 = vsel %vm251_vm0, %v363_v36, 0  ;;  %v952_v36 = vld [vmem:[%s1164_s0 + $0x1c] sm:$0xf] }
  0x98   : > { %397 = vmatpush.bf16.msrb.mxu3 %v372_v39  ;;  %v219_v39 = vld [vmem:[%s1165_s1] sm:$0xff] }
  0x99   : > { %465 = vmatpush.bf16.msra.mxu2 %v440_v38 }
  0x9a   : > { %v321_v38 = vpop.f32.mrf.mxu3 }
  0x9b   : > { %934 = vmatmul.msk.bf16.vlgmr.msrb.gmra.mxu3 %vm247_vm1, %v932_v40 }
  0x9c   : > { %478 = vmatpush.bf16.msra.mxu3 %v443_v37  ;;  %v956_v37 = vld [vmem:[%s1164_s0 + $0x20] sm:$0xf] }
  0x9d   : > { %v360_v41 = vpop.permute.xlu0 %359  ;;  %v422_v42 = vpop.permute.xlu1 %421 }
  0x9e   : > { %v364_v43 = vsel %vm361_vm2, %v358_v33, %v360_v41  ;;  %v430_v44 = vsel %vm429_vm4, %v422_v42, %v424_v34  ;;  %v562_v52 = vpop.permute.xlu2 %561 }
  0x9f   : > { %v375_v45 = vsel %vm251_vm0, %v364_v43, 0  ;;  %v437_v46 = vsel %vm251_vm0, %v430_v44, 0  ;;  %v567_v59 = vsel %vm565_vm6, %v560_v47, %v562_v52 }
  0xa0   : > { %410 = vmatpush.bf16.msra.mxu0 %v375_v45  ;;  %452 = vmatpush.bf16.msra.mxu1 %v437_v46  ;;  %v576_v63 = vsel %vm251_vm0, %v567_v59, 0 }
  0xa2   : > { %v323_v41 = vpop.f32.mrf.mxu3 }
  0xa3   : > { %930 = vmatmul.msk.bf16.vlgmr.msrb.gmra.mxu0 %vm247_vm1, %v222_v11  ;;  %931 = vmatmul.msk.bf16.vlgmr.msrb.gmra.mxu1 %vm247_vm1, %v222_v11 }
  0xa5   : > { %v494_v48 = vpop.permute.xlu0 %493  ;;  %v496_v49 = vpop.permute.xlu1 %495 }
  0xa6   : > { %933 = vmatmul.msk.bf16.vlgmr.msrb.gmra.mxu2 %vm247_vm1, %v932_v40  ;;  %v500_v50 = vsel %vm497_vm5, %v494_v48, %v496_v49  ;;  %v696_v0 = vpop.permute.xlu2 %695 }
  0xa7   : > { %v511_v51 = vsel %vm251_vm0, %v500_v50, 0 }
  0xa8   : > { %546 = vmatpush.bf16.msrb.mxu2 %v511_v51 }
  0xab   : > { %939 = vmatmul.msk.bf16.vlgmr.msra.gmra.mxu3 %vm247_vm1, %v936_v53 }
  0xad   : > { %v492_v54 = vpop.permute.xlu0 %491  ;;  %v558_v55 = vpop.permute.xlu1 %557 }
  0xae   : > { %v499_v56 = vsel %vm497_vm5, %v492_v54, %v494_v48  ;;  %v498_v57 = vsel %vm497_vm5, %v490_v32, %v492_v54  ;;  %v566_v58 = vsel %vm565_vm6, %v558_v55, %v560_v47  ;;  %v694_v6 = vpop.permute.xlu2 %693 }
  0xaf   : > { %v508_v60 = vsel %vm251_vm0, %v499_v56, 0  ;;  %v505_v61 = vsel %vm251_vm0, %v498_v57, 0  ;;  %v573_v62 = vsel %vm251_vm0, %v566_v58, 0  ;;  %v702_v11 = vsel %vm701_vm8, %v694_v6, %v696_v0 }
  0xb0   : > { %533 = vmatpush.bf16.msrb.mxu1 %v508_v60  ;;  %520 = vmatpush.bf16.msrb.mxu0 %v505_v61  ;;  %v709_v15 = vsel %vm251_vm0, %v702_v11, 0 }
  0xb1   : > { %588 = vmatpush.bf16.msrb.mxu3 %v573_v62 }
  0xb3   : > { %935 = vmatmul.msk.bf16.vlgmr.msra.gmra.mxu0 %vm247_vm1, %v932_v40  ;;  %937 = vmatmul.msk.bf16.vlgmr.msra.gmra.mxu1 %vm247_vm1, %v936_v53  ;;  %v1000_v40 = vmov 0  }
  0xb4   : > { %601 = vmatpush.bf16.msra.mxu0 %v576_v63  ;;  %982 = vset.pattern.permute.xlu2 %v1000_v40 }
  0xb5   : > { %v626_v1 = vpop.permute.xlu0 %625  ;;  %v628_v2 = vpop.permute.xlu1 %627  ;;  %983 = vset.pattern.permute.xlu0 %v1000_v40  ;;  %829 = vperm.xlu2 %982, %v219_v39   ;;  %v835_v39 = vld [vmem:[%s212_s28] sm:$0xff] }
  0xb6   : > { %938 = vmatmul.msk.bf16.vlgmr.msra.gmra.mxu2 %vm247_vm1, %v936_v53  ;;  %v634_v3 = vsel %vm633_vm7, %v626_v1, %v628_v2  ;;  %v768_v23 = vpop.permute.xlu2 %767 }
  0xb7   : > { %v641_v4 = vsel %vm251_vm0, %v634_v3, 0 }
  0xb8   : > { %656 = vmatpush.bf16.msra.mxu2 %v641_v4 }
  0xbb   : > { %945 = vmatmul.msk.bf16.vlgmr.msrb.gmra.mxu3 %vm247_vm1, %v944_v5 }
  0xbd   : > { %v564_v7 = vpop.permute.xlu0 %563  ;;  %v630_v8 = vpop.permute.xlu1 %629 }
  0xbe   : > { %v568_v9 = vsel %vm565_vm6, %v562_v52, %v564_v7  ;;  %v635_v10 = vsel %vm633_vm7, %v628_v2, %v630_v8 }
  0xbf   : > { %v579_v12 = vsel %vm251_vm0, %v568_v9, 0  ;;  %v644_v13 = vsel %vm251_vm0, %v635_v10, 0 }
  0xc0   : > { %669 = vmatpush.bf16.msra.mxu3 %v644_v13  ;;  %614 = vmatpush.bf16.msra.mxu1 %v579_v12 }
  0xc3   : > { %941 = vmatmul.msk.bf16.vlgmr.msrb.gmra.mxu0 %vm247_vm1, %v940_v14  ;;  %942 = vmatmul.msk.bf16.vlgmr.msrb.gmra.mxu1 %vm247_vm1, %v940_v14 }
  0xc4   : > { %724 = vmatpush.bf16.msrb.mxu1 %v709_v15 }
  0xc5   : > { %v698_v16 = vpop.permute.xlu0 %697  ;;  %v632_v17 = vpop.permute.xlu1 %631 }
  0xc6   : > { %943 = vmatmul.msk.bf16.vlgmr.msrb.gmra.mxu2 %vm247_vm1, %v940_v14  ;;  %v703_v18 = vsel %vm701_vm8, %v696_v0, %v698_v16  ;;  %v636_v19 = vsel %vm633_vm7, %v630_v8, %v632_v17 }
  0xc7   : > { %v712_v20 = vsel %vm251_vm0, %v703_v18, 0  ;;  %v647_v21 = vsel %vm251_vm0, %v636_v19, 0 }
  0xc8   : > { %682 = vmatpush.bf16.msrb.mxu0 %v647_v21  ;;  %737 = vmatpush.bf16.msrb.mxu2 %v712_v20 }
  0xcb   : > { %950 = vmatmul.msk.bf16.vlgmr.msra.gmra.mxu3 %vm247_vm1, %v948_v22 }
  0xcd   : > { %v700_v24 = vpop.permute.xlu0 %699  ;;  %v766_v25 = vpop.permute.xlu1 %765 }
  0xce   : > { %v704_v26 = vsel %vm701_vm8, %v698_v16, %v700_v24  ;;  %v772_v28 = vsel %vm769_vm9, %v766_v25, %v768_v23 }
  0xcf   : > { %v715_v27 = vsel %vm251_vm0, %v704_v26, 0  ;;  %v783_v29 = vsel %vm251_vm0, %v772_v28, 0 }
  0xd0   : > { %750 = vmatpush.bf16.msrb.mxu3 %v715_v27 }
  0xd3   : > { %946 = vmatmul.msk.bf16.vlgmr.msra.gmra.mxu0 %vm247_vm1, %v944_v5  ;;  %947 = vmatmul.msk.bf16.vlgmr.msra.gmra.mxu1 %vm247_vm1, %v944_v5 }
  0xd5   : > { %v764_v30 = vpop.permute.xlu1 %763  ;;  %v762_v31 = vpop.permute.xlu0 %761 }
  0xd6   : > { %949 = vmatmul.msk.bf16.vlgmr.msra.gmra.mxu2 %vm247_vm1, %v948_v22  ;;  %v771_v32 = vsel %vm769_vm9, %v764_v30, %v766_v25  ;;  %v770_v33 = vsel %vm769_vm9, %v762_v31, %v764_v30 }
  0xd7   : > { %818 = vmatpush.bf16.msra.mxu2 %v783_v29  ;;  %v780_v34 = vsel %vm251_vm0, %v771_v32, 0  ;;  %v777_v35 = vsel %vm251_vm0, %v770_v33, 0 }
  0xd8   : > { %805 = vmatpush.bf16.msra.mxu1 %v780_v34  ;;  %792 = vmatpush.bf16.msra.mxu0 %v777_v35 }
  0xdb   : > { %955 = vmatmul.msk.bf16.vlgmr.msrb.gmra.mxu3 %vm247_vm1, %v952_v36 }
  0xe3   : > { %951 = vmatmul.msk.bf16.vlgmr.msrb.gmra.mxu0 %vm247_vm1, %v948_v22  ;;  %953 = vmatmul.msk.bf16.vlgmr.msrb.gmra.mxu1 %vm247_vm1, %v952_v36 }
  0xe6   : > { %954 = vmatmul.msk.bf16.vlgmr.msrb.gmra.mxu2 %vm247_vm1, %v952_v36 }
  0xf3   : > { %957 = vmatmul.msk.bf16.vlgmr.msra.gmra.mxu0 %vm247_vm1, %v956_v37  ;;  %958 = vmatmul.msk.bf16.vlgmr.msra.gmra.mxu1 %vm247_vm1, %v956_v37 }
  0xf6   : > { %959 = vmatmul.msk.bf16.vlgmr.msra.gmra.mxu2 %vm247_vm1, %v956_v37 }
 0x110   : > { %v270_v42 = vpop.f32.mrf.mxu0  ;;  %v283_v43 = vpop.f32.mrf.mxu1 }
 0x111   : > { %v322_v44 = vadd.f32 %v321_v38, %v270_v42 }
 0x118   : > { %v272_v46 = vpop.f32.mrf.mxu0  ;;  %v285_v47 = vpop.f32.mrf.mxu1 }
 0x119   : > { %v296_v45 = vpop.f32.mrf.mxu2 }
 0x11e   : > { %v399_v48 = vpop.f32.mrf.mxu3 }
 0x120   : > { %v334_v50 = vpop.f32.mrf.mxu0  ;;  %v347_v51 = vpop.f32.mrf.mxu1 }
 0x121   : > { %v298_v49 = vpop.f32.mrf.mxu2  ;;  %v335_v52 = vadd.f32 %v334_v50, %v283_v43  ;;  %v348_v53 = vadd.f32 %v347_v51, %v296_v45  ;;  %v830_v43 = vpop.permute.xlu2 %829  ;;  %v838_v50 = vunpack.c.h.bf16 %v835_v39 }
 0x122   : > { %v837_v49 = vunpack.c.l.bf16 %v835_v39 }
 0x123   : > { %v417_v54 = vadd.f32 %v399_v48, %v335_v52 }
 0x126   : > { %v401_v55 = vpop.f32.mrf.mxu3 }
 0x128   : > { %v336_v57 = vpop.f32.mrf.mxu0  ;;  %v349_v58 = vpop.f32.mrf.mxu1 }
 0x129   : > { %v386_v56 = vpop.f32.mrf.mxu2 }
 0x12a   : > { %v416_v23 = vadd.f32 %v386_v56, %v322_v44  ;;  %v836_v56 = vld [vmem:[%s212_s28 + $0x8] sm:$0xf] }
 0x12e   : > { %v480_v59 = vpop.f32.mrf.mxu3 }
 0x130   : > { %v412_v61 = vpop.f32.mrf.mxu0  ;;  %v454_v62 = vpop.f32.mrf.mxu1 }
 0x131   : > { %v388_v60 = vpop.f32.mrf.mxu2  ;;  %v484_v24 = vadd.f32 %v454_v62, %v416_v23  ;;  %v418_v30 = vadd.f32 %v412_v61, %v348_v53  ;;  %v839_v62 = vunpack.c.l.bf16 %v836_v56 }
 0x133   : > { %v486_v35 = vadd.f32 %v480_v59, %v418_v30 }
 0x136   : > { %v482_v63 = vpop.f32.mrf.mxu3 }
 0x138   : > { %v414_v1 = vpop.f32.mrf.mxu0  ;;  %v456_v2 = vpop.f32.mrf.mxu1 }
 0x139   : > { %v467_v0 = vpop.f32.mrf.mxu2 }
 0x13a   : > { %v485_v25 = vadd.f32 %v467_v0, %v417_v54 }
 0x13e   : > { %v590_v3 = vpop.f32.mrf.mxu3 }
 0x140   : > { %v522_v5 = vpop.f32.mrf.mxu0  ;;  %v535_v6 = vpop.f32.mrf.mxu1 }
 0x141   : > { %v469_v4 = vpop.f32.mrf.mxu2  ;;  %v552_v27 = vadd.f32 %v522_v5, %v484_v24  ;;  %v553_v28 = vadd.f32 %v535_v6, %v485_v25 }
 0x143   : > { %v620_v34 = vadd.f32 %v590_v3, %v552_v27 }
 0x146   : > { %v592_v7 = vpop.f32.mrf.mxu3 }
 0x148   : > { %v524_v9 = vpop.f32.mrf.mxu0  ;;  %v537_v10 = vpop.f32.mrf.mxu1 }
 0x149   : > { %v548_v8 = vpop.f32.mrf.mxu2 }
 0x14a   : > { %v554_v38 = vadd.f32 %v548_v8, %v486_v35 }
 0x14e   : > { %v671_v11 = vpop.f32.mrf.mxu3 }
 0x150   : > { %v603_v13 = vpop.f32.mrf.mxu0  ;;  %v616_v14 = vpop.f32.mrf.mxu1 }
 0x151   : > { %v550_v12 = vpop.f32.mrf.mxu2  ;;  %v621_v33 = vadd.f32 %v603_v13, %v553_v28  ;;  %v622_v44 = vadd.f32 %v616_v14, %v554_v38 }
 0x153   : > { %v689_v36 = vadd.f32 %v671_v11, %v621_v33 }
 0x156   : > { %v673_v15 = vpop.f32.mrf.mxu3 }
 0x158   : > { %v605_v17 = vpop.f32.mrf.mxu0  ;;  %v618_v18 = vpop.f32.mrf.mxu1 }
 0x159   : > { %v658_v16 = vpop.f32.mrf.mxu2 }
 0x15a   : > { %v688_v37 = vadd.f32 %v658_v16, %v620_v34 }
 0x15e   : > { %v752_v19 = vpop.f32.mrf.mxu3 }
 0x160   : > { %v684_v21 = vpop.f32.mrf.mxu0  ;;  %v726_v22 = vpop.f32.mrf.mxu1 }
 0x161   : > { %v660_v20 = vpop.f32.mrf.mxu2  ;;  %v756_v40 = vadd.f32 %v726_v22, %v688_v37  ;;  %v690_v51 = vadd.f32 %v684_v21, %v622_v44 }
 0x163   : > { %v758_v57 = vadd.f32 %v752_v19, %v690_v51 }
 0x166   : > { %v754_v26 = vpop.f32.mrf.mxu3 }
 0x168   : > { %v686_v31 = vpop.f32.mrf.mxu0  ;;  %v728_v32 = vpop.f32.mrf.mxu1 }
 0x169   : > { %v739_v29 = vpop.f32.mrf.mxu2 }
 0x16a   : > { %v757_v41 = vadd.f32 %v739_v29, %v689_v36 }
 0x170   : > { %v794_v45 = vpop.f32.mrf.mxu0  ;;  %v807_v46 = vpop.f32.mrf.mxu1 }
 0x171   : > { %v741_v42 = vpop.f32.mrf.mxu2  ;;  %v824_v47 = vadd.f32 %v794_v45, %v756_v40  ;;  %v825_v48 = vadd.f32 %v807_v46, %v757_v41 }
 0x173   : > { %v832_v52 = vadd.f32 %v830_v43, %v824_v47  ;;  %v833_v53 = vadd.f32 %v830_v43, %v825_v48 }
 0x175   : > { %v840_v54 = vadd.f32 %v837_v49, %v832_v52  ;;  %v841_v55 = vadd.f32 %v838_v50, %v833_v53 }
 0x177   : > { %v843_v58 = vmax.f32 %v840_v54, 0.0  ;;  %v844_v59 = vmax.f32 %v841_v55, 0.0 }
 0x178   : > { %v796_v63 = vpop.f32.mrf.mxu0  ;;  %v809_v0 = vpop.f32.mrf.mxu1 }
 0x179   : > { %v820_v60 = vpop.f32.mrf.mxu2  ;;  %846 = vst [vmem:[%s217_s6] sm:$0xff] %v843_v58 }
 0x17a   : > { %v826_v61 = vadd.f32 %v820_v60, %v758_v57  ;;  %847 = vst [vmem:[%s217_s6 + $0x8] sm:$0xff] %v844_v59 }
 0x17c   : > { %v834_v1 = vadd.f32 %v830_v43, %v826_v61 }
 0x17e   : > { %v842_v2 = vadd.f32 %v839_v62, %v834_v1 }
 0x180   : > { %v845_v3 = vmax.f32 %v842_v2, 0.0 }
 0x181   : > { %v822_v4 = vpop.f32.mrf.mxu2 }
 0x182   : > { %848 = vst [vmem:[%s217_s6 + $0x10] sm:$0xff] %v845_v3 }
 0x183 PF: > { %s14_s15 = sadd.s32 1, %s990_s15  }
 0x184   : > { %p11_p4 = scmp.ge.s32.totalorder %s14_s15, 4  }
 0x186   :  { %13 = sbr.rel (!%p11_p4) target bundleno = 1 (0x1), region = 77 }

</bundles_post_ra>
